<compile_context>
chip_gen: v7x
topology: tpu7x:2x2x1
jax: 0.10.0
libtpu: 0.0.40
codegen_flags: <defaults>
</compile_context>

<pallas_src>
import jax
import jax.numpy as jnp
from jax import lax
from jax.experimental import pallas as pl
from jax.experimental.pallas import tpu as pltpu

EPS = 1e-5


def deeponet_kernel(x_ref, w1_ref, wh_ref, w5_ref, b5_ref, gb_ref, o_ref):
    # x_ref : (N, S+2)     fused [u | y], f32
    # w1_ref: (S+2, 2H)    block-diag(B1.W, T1.W)       (matmul dtype)
    # wh_ref: (3, 2H, 2H)  block-diag(Bk.W, Tk.W), k=2..4 (matmul dtype)
    # w5_ref: (2H, 2P)     block-diag(B5.W, T5.W)       (matmul dtype)
    # b5_ref: (1, 2P)      [B5.b | T5.b], f32
    # gb_ref: (8, 2H)      rows 0..3 fused gammas, rows 4..7 fused betas, f32
    # o_ref : (1, N)       lane-dense row of outputs, f32
    x = x_ref[...]
    gb = gb_ref[...]                      # hoisted: one (8, 2H) load, sliced as value
    mdt = w1_ref.dtype                    # matmul dtype (f32 or bf16)

    n = x.shape[0]
    inv_n = 1.0 / n
    ones_n = jnp.ones((1, n), jnp.float32)

    def bn_tanh(h, gamma, beta):
        # Training-mode BatchNorm1d (biased batch variance) folded into scale/shift.
        # Stats computed on the MXU via ones-vector contractions; VPU only does one
        # h*h pass. var = E[h^2] - mean^2, clamped (f32 throughout).
        s1 = lax.dot_general(ones_n, h, (((1,), (0,)), ((), ())),
                             preferred_element_type=jnp.float32)
        s2 = lax.dot_general(ones_n, h * h, (((1,), (0,)), ((), ())),
                             preferred_element_type=jnp.float32)
        mean = s1 * inv_n
        var = jnp.maximum(s2 * inv_n - mean * mean, 0.0)
        scale = gamma * lax.rsqrt(var + EPS)
        shift = beta - mean * scale
        return jnp.tanh(h * scale + shift)

    # Layer 1 (hidden biases dropped: cancelled exactly by training-mode BN).
    h = jnp.dot(x.astype(mdt), w1_ref[...], preferred_element_type=jnp.float32)
    x = bn_tanh(h, gb[0:1, :], gb[4:5, :])

    # Layers 2..4 (static unroll; weights sliced from one stacked slab).
    for l in range(3):
        h = jnp.dot(x.astype(mdt), wh_ref[l], preferred_element_type=jnp.float32)
        x = bn_tanh(h, gb[l + 1:l + 2, :], gb[l + 5:l + 6, :])

    # Layer 5 (no BN -> keep bias), still fused: z = [branch_out | trunk_out] (f32).
    z = jnp.dot(x.astype(mdt), w5_ref[...],
                preferred_element_type=jnp.float32) + b5_ref[...]
    p = z.shape[1] // 2
    prod = z[:, :p] * z[:, p:]                                    # (N, P)

    # Row-wise dot -> (1, N) lane-dense output: out[0, n] = sum_p prod[n, p]
    ones_p = jnp.ones((1, p), jnp.float32)
    o_ref[...] = lax.dot_general(ones_p, prod, (((1,), (1,)), ((), ())),
                                 preferred_element_type=jnp.float32)


def _block_diag(a, b):
    za = jnp.zeros((a.shape[0], b.shape[1]), a.dtype)
    zb = jnp.zeros((b.shape[0], a.shape[1]), b.dtype)
    return jnp.concatenate(
        [jnp.concatenate([a, za], axis=1), jnp.concatenate([zb, b], axis=1)], axis=0)


def pack_params(branch_params, trunk_params, matmul_dtype=jnp.float32):
    """Pack 36 per-layer tensors into 5 lane-dense slabs for the fused kernel."""
    bp, tp = branch_params, trunk_params
    w1 = _block_diag(bp[0], tp[0]).astype(matmul_dtype)                 # (S+2, 2H)
    wh = jnp.stack([_block_diag(bp[4 * k], tp[4 * k]) for k in range(1, 4)],
                   axis=0).astype(matmul_dtype)                         # (3, 2H, 2H)
    w5 = _block_diag(bp[16], tp[16]).astype(matmul_dtype)               # (2H, 2P)
    b5 = jnp.concatenate([bp[17], tp[17]], axis=1).astype(jnp.float32)  # (1, 2P)
    gammas = [jnp.concatenate([bp[4 * k + 2], tp[4 * k + 2]], axis=1) for k in range(4)]
    betas = [jnp.concatenate([bp[4 * k + 3], tp[4 * k + 3]], axis=1) for k in range(4)]
    gb = jnp.concatenate(gammas + betas, axis=0).astype(jnp.float32)    # (8, 2H)
    # Hidden-layer biases bp/tp[4k+1] (k<4) intentionally not packed: training-mode BN
    # subtracts the batch mean, which cancels them exactly.
    return w1, wh, w5, b5, gb


def _vmem_budget_bytes(n, in_dim, h2, p2):
    """Realistic lane-padded VMEM footprint + headroom, clamped to the chip's VMEM."""
    def padded(rows, cols, itemsize=4):
        return (-(-rows // 8) * 8) * (-(-cols // 128) * 128) * itemsize

    act = padded(n, max(in_dim, h2, p2))
    footprint = (padded(n, in_dim)                         # fused input x
                 + 4 * act                                 # live h / x / prod / temps
                 + padded(in_dim, h2)                      # w1
                 + 3 * padded(h2, h2)                      # wh slab
                 + padded(h2, p2)                          # w5
                 + padded(1, p2) + padded(8, h2)           # b5, gb
                 + padded(1, n))                           # (1, N) output row
    budget = int(footprint * 1.5) + (2 << 20)              # compiler-temp headroom
    try:
        cap = int(getattr(pltpu.get_tpu_info(), "vmem_capacity_bytes", 64 << 20))
    except Exception:
        cap = 64 << 20                                     # conservative (v7x per-TC)
    return max(4 << 20, min(budget, int(cap * 0.9)))


def deeponet_forward(u, y, branch_params, trunk_params, matmul_dtype=jnp.float32):
    n = u.shape[0]
    x = jnp.concatenate([u, y], axis=1).astype(jnp.float32)             # (N, S+2)
    w1, wh, w5, b5, gb = pack_params(branch_params, trunk_params, matmul_dtype)

    inputs = (x, w1, wh, w5, b5, gb)
    in_dim = x.shape[1]
    h2 = w1.shape[1]                                                    # 2H
    p2 = w5.shape[1]                                                    # 2P

    in_bytes = sum(int(a.size) * a.dtype.itemsize for a in inputs)
    out_bytes = n * 4
    # Matmul flops (layers + BN-stat contractions + output row-dot).
    flops = (2 * n * (in_dim * h2 + 3 * h2 * h2 + h2 * p2 + p2)
             + 4 * 2 * 2 * n * h2)
    transcend = 4 * n * h2 + 4 * h2                                     # tanh + rsqrt

    vmem_spec = pl.BlockSpec(memory_space=pltpu.MemorySpace.VMEM)
    out = pl.pallas_call(
        deeponet_kernel,
        out_shape=jax.ShapeDtypeStruct((1, n), jnp.float32),
        in_specs=[vmem_spec] * len(inputs),
        out_specs=vmem_spec,
        compiler_params=pltpu.CompilerParams(
            vmem_limit_bytes=_vmem_budget_bytes(n, in_dim, h2, p2)),
        cost_estimate=pl.CostEstimate(
            flops=flops, transcendentals=transcend,
            bytes_accessed=in_bytes + out_bytes),
    )(*inputs)
    return out[0]                                                       # (N,)


def _init_linear(key, fan_in, fan_out):
    # Shapes match torch.nn.Linear(fan_in, fan_out); stored as (in, out) so x @ W + b.
    kw, kb = jax.random.split(key)
    bound = 1.0 / (fan_in ** 0.5)
    W = jax.random.uniform(kw, (fan_in, fan_out), jnp.float32, -bound, bound)
    b = jax.random.uniform(kb, (1, fan_out), jnp.float32, -bound, bound)
    return W, b


def _init_bn(key, h):
    kg, kb = jax.random.split(key)
    gamma = 1.0 + 0.1 * jax.random.normal(kg, (1, h), jnp.float32)
    beta = 0.1 * jax.random.normal(kb, (1, h), jnp.float32)
    return gamma, beta


def make_params(key, in_dim, n_hidden, n_output):
    """Flat per-layer param list: [W1,b1,g1,beta1, ..., W4,b4,g4,beta4, W5,b5]."""
    dims = [in_dim, n_hidden, n_hidden, n_hidden, n_hidden, n_output]
    params = []
    keys = jax.random.split(key, 9)
    for i in range(4):
        W, b = _init_linear(keys[2 * i], dims[i], dims[i + 1])
        g, bt = _init_bn(keys[2 * i + 1], dims[i + 1])
        params += [W, b, g, bt]
    W, b = _init_linear(keys[8], dims[4], dims[5])
    params += [W, b]
    return params


def reference_forward(u, y, branch_params, trunk_params):
    # Unfused, with biases and sqrt+divide BN — exactly the PyTorch training-mode math.
    def stack(x, p):
        idx = 0
        for _ in range(4):
            W, b, g, bt = p[idx], p[idx + 1], p[idx + 2], p[idx + 3]
            idx += 4
            h = x @ W + b
            mean = jnp.mean(h, axis=0, keepdims=True)
            var = jnp.mean((h - mean) ** 2, axis=0, keepdims=True)
            x = jnp.tanh((h - mean) / jnp.sqrt(var + EPS) * g + bt)
        return x @ p[idx] + p[idx + 1]

    b = stack(u, branch_params)
    t = stack(y, trunk_params)
    return jnp.sum(b * t, axis=1)


if __name__ == "__main__":
    n_sensors, n_hidden, n_output, batch = 16, 32, 8, 8

    key = jax.random.PRNGKey(0)
    k_u, k_y, k_b, k_t = jax.random.split(key, 4)

    u = jax.random.normal(k_u, (batch, n_sensors), jnp.float32)
    y = jax.random.normal(k_y, (batch, 2), jnp.float32)

    branch_params = make_params(k_b, n_sensors, n_hidden, n_output)
    trunk_params = make_params(k_t, 2, n_hidden, n_output)

    out = deeponet_forward(u, y, branch_params, trunk_params)
    out = jax.block_until_ready(out)

    ref = reference_forward(u, y, branch_params, trunk_params)
    assert out.shape == (batch,)
    assert jnp.allclose(out, ref, atol=1e-4, rtol=1e-4), (out, ref)

    print("KERNEL_OK")
</pallas_src>

<mosaic_0001>
module attributes {stable_mosaic.version = 11 : i64} {
  func.func @deeponet_kernel(%arg0: memref<8x18xf32, #tpu.memory_space<vmem>>, %arg1: memref<18x64xf32, #tpu.memory_space<vmem>>, %arg2: memref<3x64x64xf32, #tpu.memory_space<vmem>>, %arg3: memref<64x16xf32, #tpu.memory_space<vmem>>, %arg4: memref<1x16xf32, #tpu.memory_space<vmem>>, %arg5: memref<8x64xf32, #tpu.memory_space<vmem>>, %arg6: memref<1x8xf32, #tpu.memory_space<vmem>>) attributes {dimension_semantics = [], scalar_prefetch = 0 : i64, scratch_operands = 0 : i64, tpu.core_type = #tpu.core_type<tc>} {
    %c0 = arith.constant 0 : index
    %c0_0 = arith.constant 0 : index
    %0 = vector.load %arg0[%c0, %c0_0] : memref<8x18xf32, #tpu.memory_space<vmem>>, vector<8x18xf32>
    %c0_1 = arith.constant 0 : index
    %c0_2 = arith.constant 0 : index
    %1 = vector.load %arg5[%c0_1, %c0_2] : memref<8x64xf32, #tpu.memory_space<vmem>>, vector<8x64xf32>
    %cst = arith.constant 1.000000e+00 : f32
    %2 = vector.broadcast %cst : f32 to vector<1x8xf32>
    %c0_3 = arith.constant 0 : index
    %c0_4 = arith.constant 0 : index
    %3 = vector.load %arg1[%c0_3, %c0_4] : memref<18x64xf32, #tpu.memory_space<vmem>>, vector<18x64xf32>
    %cst_5 = arith.constant dense<0.000000e+00> : vector<8x64xf32>
    %4 = tpu.matmul %0, %3, %cst_5 {dimension_numbers = #tpu.dot_dimension_numbers<[1], [0], [0], [1], [0, 0, 1, 1], [], []>} : vector<8x18xf32>, vector<18x64xf32>, vector<8x64xf32> -> vector<8x64xf32>
    %5 = vector.extract_strided_slice %1 {offsets = [0, 0], sizes = [1, 64], strides = [1, 1]} : vector<8x64xf32> to vector<1x64xf32>
    %6 = vector.extract_strided_slice %1 {offsets = [4, 0], sizes = [1, 64], strides = [1, 1]} : vector<8x64xf32> to vector<1x64xf32>
    %cst_6 = arith.constant dense<0.000000e+00> : vector<1x64xf32>
    %7 = tpu.matmul %2, %4, %cst_6 {dimension_numbers = #tpu.dot_dimension_numbers<[1], [0], [0], [1], [0, 0, 1, 1], [], []>} : vector<1x8xf32>, vector<8x64xf32>, vector<1x64xf32> -> vector<1x64xf32>
    %8 = arith.mulf %4, %4 : vector<8x64xf32>
    %cst_7 = arith.constant dense<0.000000e+00> : vector<1x64xf32>
    %9 = tpu.matmul %2, %8, %cst_7 {dimension_numbers = #tpu.dot_dimension_numbers<[1], [0], [0], [1], [0, 0, 1, 1], [], []>} : vector<1x8xf32>, vector<8x64xf32>, vector<1x64xf32> -> vector<1x64xf32>
    %cst_8 = arith.constant 1.250000e-01 : f32
    %10 = vector.broadcast %cst_8 : f32 to vector<1x64xf32>
    %11 = arith.mulf %7, %10 : vector<1x64xf32>
    %cst_9 = arith.constant 1.250000e-01 : f32
    %12 = vector.broadcast %cst_9 : f32 to vector<1x64xf32>
    %13 = arith.mulf %9, %12 : vector<1x64xf32>
    %14 = arith.mulf %11, %11 : vector<1x64xf32>
    %15 = arith.subf %13, %14 : vector<1x64xf32>
    %cst_10 = arith.constant 0.000000e+00 : f32
    %16 = vector.broadcast %cst_10 : f32 to vector<1x64xf32>
    %17 = arith.maximumf %15, %16 : vector<1x64xf32>
    %cst_11 = arith.constant 9.99999974E-6 : f32
    %18 = vector.broadcast %cst_11 : f32 to vector<1x64xf32>
    %19 = arith.addf %17, %18 : vector<1x64xf32>
    %20 = math.rsqrt %19 : vector<1x64xf32>
    %21 = arith.mulf %5, %20 : vector<1x64xf32>
    %22 = arith.mulf %11, %21 : vector<1x64xf32>
    %23 = arith.subf %6, %22 : vector<1x64xf32>
    %24 = vector.broadcast %21 : vector<1x64xf32> to vector<8x64xf32>
    %25 = arith.mulf %4, %24 : vector<8x64xf32>
    %26 = vector.broadcast %23 : vector<1x64xf32> to vector<8x64xf32>
    %27 = arith.addf %25, %26 : vector<8x64xf32>
    %28 = math.tanh %27 : vector<8x64xf32>
    %c0_12 = arith.constant 0 : index
    %c0_13 = arith.constant 0 : index
    %c0_14 = arith.constant 0 : index
    %29 = vector.load %arg2[%c0_12, %c0_13, %c0_14] : memref<3x64x64xf32, #tpu.memory_space<vmem>>, vector<1x64x64xf32>
    %30 = vector.shape_cast %29 : vector<1x64x64xf32> to vector<64x64xf32>
    %cst_15 = arith.constant dense<0.000000e+00> : vector<8x64xf32>
    %31 = tpu.matmul %28, %30, %cst_15 {dimension_numbers = #tpu.dot_dimension_numbers<[1], [0], [0], [1], [0, 0, 1, 1], [], []>} : vector<8x64xf32>, vector<64x64xf32>, vector<8x64xf32> -> vector<8x64xf32>
    %32 = vector.extract_strided_slice %1 {offsets = [1, 0], sizes = [1, 64], strides = [1, 1]} : vector<8x64xf32> to vector<1x64xf32>
    %33 = vector.extract_strided_slice %1 {offsets = [5, 0], sizes = [1, 64], strides = [1, 1]} : vector<8x64xf32> to vector<1x64xf32>
    %cst_16 = arith.constant dense<0.000000e+00> : vector<1x64xf32>
    %34 = tpu.matmul %2, %31, %cst_16 {dimension_numbers = #tpu.dot_dimension_numbers<[1], [0], [0], [1], [0, 0, 1, 1], [], []>} : vector<1x8xf32>, vector<8x64xf32>, vector<1x64xf32> -> vector<1x64xf32>
    %35 = arith.mulf %31, %31 : vector<8x64xf32>
    %cst_17 = arith.constant dense<0.000000e+00> : vector<1x64xf32>
    %36 = tpu.matmul %2, %35, %cst_17 {dimension_numbers = #tpu.dot_dimension_numbers<[1], [0], [0], [1], [0, 0, 1, 1], [], []>} : vector<1x8xf32>, vector<8x64xf32>, vector<1x64xf32> -> vector<1x64xf32>
    %cst_18 = arith.constant 1.250000e-01 : f32
    %37 = vector.broadcast %cst_18 : f32 to vector<1x64xf32>
    %38 = arith.mulf %34, %37 : vector<1x64xf32>
    %cst_19 = arith.constant 1.250000e-01 : f32
    %39 = vector.broadcast %cst_19 : f32 to vector<1x64xf32>
    %40 = arith.mulf %36, %39 : vector<1x64xf32>
    %41 = arith.mulf %38, %38 : vector<1x64xf32>
    %42 = arith.subf %40, %41 : vector<1x64xf32>
    %cst_20 = arith.constant 0.000000e+00 : f32
    %43 = vector.broadcast %cst_20 : f32 to vector<1x64xf32>
    %44 = arith.maximumf %42, %43 : vector<1x64xf32>
    %cst_21 = arith.constant 9.99999974E-6 : f32
    %45 = vector.broadcast %cst_21 : f32 to vector<1x64xf32>
    %46 = arith.addf %44, %45 : vector<1x64xf32>
    %47 = math.rsqrt %46 : vector<1x64xf32>
    %48 = arith.mulf %32, %47 : vector<1x64xf32>
    %49 = arith.mulf %38, %48 : vector<1x64xf32>
    %50 = arith.subf %33, %49 : vector<1x64xf32>
    %51 = vector.broadcast %48 : vector<1x64xf32> to vector<8x64xf32>
    %52 = arith.mulf %31, %51 : vector<8x64xf32>
    %53 = vector.broadcast %50 : vector<1x64xf32> to vector<8x64xf32>
    %54 = arith.addf %52, %53 : vector<8x64xf32>
    %55 = math.tanh %54 : vector<8x64xf32>
    %c1 = arith.constant 1 : index
    %c0_22 = arith.constant 0 : index
    %c0_23 = arith.constant 0 : index
    %56 = vector.load %arg2[%c1, %c0_22, %c0_23] : memref<3x64x64xf32, #tpu.memory_space<vmem>>, vector<1x64x64xf32>
    %57 = vector.shape_cast %56 : vector<1x64x64xf32> to vector<64x64xf32>
    %cst_24 = arith.constant dense<0.000000e+00> : vector<8x64xf32>
    %58 = tpu.matmul %55, %57, %cst_24 {dimension_numbers = #tpu.dot_dimension_numbers<[1], [0], [0], [1], [0, 0, 1, 1], [], []>} : vector<8x64xf32>, vector<64x64xf32>, vector<8x64xf32> -> vector<8x64xf32>
    %59 = vector.extract_strided_slice %1 {offsets = [2, 0], sizes = [1, 64], strides = [1, 1]} : vector<8x64xf32> to vector<1x64xf32>
    %60 = vector.extract_strided_slice %1 {offsets = [6, 0], sizes = [1, 64], strides = [1, 1]} : vector<8x64xf32> to vector<1x64xf32>
    %cst_25 = arith.constant dense<0.000000e+00> : vector<1x64xf32>
    %61 = tpu.matmul %2, %58, %cst_25 {dimension_numbers = #tpu.dot_dimension_numbers<[1], [0], [0], [1], [0, 0, 1, 1], [], []>} : vector<1x8xf32>, vector<8x64xf32>, vector<1x64xf32> -> vector<1x64xf32>
    %62 = arith.mulf %58, %58 : vector<8x64xf32>
    %cst_26 = arith.constant dense<0.000000e+00> : vector<1x64xf32>
    %63 = tpu.matmul %2, %62, %cst_26 {dimension_numbers = #tpu.dot_dimension_numbers<[1], [0], [0], [1], [0, 0, 1, 1], [], []>} : vector<1x8xf32>, vector<8x64xf32>, vector<1x64xf32> -> vector<1x64xf32>
    %cst_27 = arith.constant 1.250000e-01 : f32
    %64 = vector.broadcast %cst_27 : f32 to vector<1x64xf32>
    %65 = arith.mulf %61, %64 : vector<1x64xf32>
    %cst_28 = arith.constant 1.250000e-01 : f32
    %66 = vector.broadcast %cst_28 : f32 to vector<1x64xf32>
    %67 = arith.mulf %63, %66 : vector<1x64xf32>
    %68 = arith.mulf %65, %65 : vector<1x64xf32>
    %69 = arith.subf %67, %68 : vector<1x64xf32>
    %cst_29 = arith.constant 0.000000e+00 : f32
    %70 = vector.broadcast %cst_29 : f32 to vector<1x64xf32>
    %71 = arith.maximumf %69, %70 : vector<1x64xf32>
    %cst_30 = arith.constant 9.99999974E-6 : f32
    %72 = vector.broadcast %cst_30 : f32 to vector<1x64xf32>
    %73 = arith.addf %71, %72 : vector<1x64xf32>
    %74 = math.rsqrt %73 : vector<1x64xf32>
    %75 = arith.mulf %59, %74 : vector<1x64xf32>
    %76 = arith.mulf %65, %75 : vector<1x64xf32>
    %77 = arith.subf %60, %76 : vector<1x64xf32>
    %78 = vector.broadcast %75 : vector<1x64xf32> to vector<8x64xf32>
    %79 = arith.mulf %58, %78 : vector<8x64xf32>
    %80 = vector.broadcast %77 : vector<1x64xf32> to vector<8x64xf32>
    %81 = arith.addf %79, %80 : vector<8x64xf32>
    %82 = math.tanh %81 : vector<8x64xf32>
    %c2 = arith.constant 2 : index
    %c0_31 = arith.constant 0 : index
    %c0_32 = arith.constant 0 : index
    %83 = vector.load %arg2[%c2, %c0_31, %c0_32] : memref<3x64x64xf32, #tpu.memory_space<vmem>>, vector<1x64x64xf32>
    %84 = vector.shape_cast %83 : vector<1x64x64xf32> to vector<64x64xf32>
    %cst_33 = arith.constant dense<0.000000e+00> : vector<8x64xf32>
    %85 = tpu.matmul %82, %84, %cst_33 {dimension_numbers = #tpu.dot_dimension_numbers<[1], [0], [0], [1], [0, 0, 1, 1], [], []>} : vector<8x64xf32>, vector<64x64xf32>, vector<8x64xf32> -> vector<8x64xf32>
    %86 = vector.extract_strided_slice %1 {offsets = [3, 0], sizes = [1, 64], strides = [1, 1]} : vector<8x64xf32> to vector<1x64xf32>
    %87 = vector.extract_strided_slice %1 {offsets = [7, 0], sizes = [1, 64], strides = [1, 1]} : vector<8x64xf32> to vector<1x64xf32>
    %cst_34 = arith.constant dense<0.000000e+00> : vector<1x64xf32>
    %88 = tpu.matmul %2, %85, %cst_34 {dimension_numbers = #tpu.dot_dimension_numbers<[1], [0], [0], [1], [0, 0, 1, 1], [], []>} : vector<1x8xf32>, vector<8x64xf32>, vector<1x64xf32> -> vector<1x64xf32>
    %89 = arith.mulf %85, %85 : vector<8x64xf32>
    %cst_35 = arith.constant dense<0.000000e+00> : vector<1x64xf32>
    %90 = tpu.matmul %2, %89, %cst_35 {dimension_numbers = #tpu.dot_dimension_numbers<[1], [0], [0], [1], [0, 0, 1, 1], [], []>} : vector<1x8xf32>, vector<8x64xf32>, vector<1x64xf32> -> vector<1x64xf32>
    %cst_36 = arith.constant 1.250000e-01 : f32
    %91 = vector.broadcast %cst_36 : f32 to vector<1x64xf32>
    %92 = arith.mulf %88, %91 : vector<1x64xf32>
    %cst_37 = arith.constant 1.250000e-01 : f32
    %93 = vector.broadcast %cst_37 : f32 to vector<1x64xf32>
    %94 = arith.mulf %90, %93 : vector<1x64xf32>
    %95 = arith.mulf %92, %92 : vector<1x64xf32>
    %96 = arith.subf %94, %95 : vector<1x64xf32>
    %cst_38 = arith.constant 0.000000e+00 : f32
    %97 = vector.broadcast %cst_38 : f32 to vector<1x64xf32>
    %98 = arith.maximumf %96, %97 : vector<1x64xf32>
    %cst_39 = arith.constant 9.99999974E-6 : f32
    %99 = vector.broadcast %cst_39 : f32 to vector<1x64xf32>
    %100 = arith.addf %98, %99 : vector<1x64xf32>
    %101 = math.rsqrt %100 : vector<1x64xf32>
    %102 = arith.mulf %86, %101 : vector<1x64xf32>
    %103 = arith.mulf %92, %102 : vector<1x64xf32>
    %104 = arith.subf %87, %103 : vector<1x64xf32>
    %105 = vector.broadcast %102 : vector<1x64xf32> to vector<8x64xf32>
    %106 = arith.mulf %85, %105 : vector<8x64xf32>
    %107 = vector.broadcast %104 : vector<1x64xf32> to vector<8x64xf32>
    %108 = arith.addf %106, %107 : vector<8x64xf32>
    %109 = math.tanh %108 : vector<8x64xf32>
    %c0_40 = arith.constant 0 : index
    %c0_41 = arith.constant 0 : index
    %110 = vector.load %arg3[%c0_40, %c0_41] : memref<64x16xf32, #tpu.memory_space<vmem>>, vector<64x16xf32>
    %cst_42 = arith.constant dense<0.000000e+00> : vector<8x16xf32>
    %111 = tpu.matmul %109, %110, %cst_42 {dimension_numbers = #tpu.dot_dimension_numbers<[1], [0], [0], [1], [0, 0, 1, 1], [], []>} : vector<8x64xf32>, vector<64x16xf32>, vector<8x16xf32> -> vector<8x16xf32>
    %c0_43 = arith.constant 0 : index
    %c0_44 = arith.constant 0 : index
    %112 = vector.load %arg4[%c0_43, %c0_44] : memref<1x16xf32, #tpu.memory_space<vmem>>, vector<1x16xf32>
    %113 = vector.broadcast %112 : vector<1x16xf32> to vector<8x16xf32>
    %114 = arith.addf %111, %113 : vector<8x16xf32>
    %115 = vector.extract_strided_slice %114 {offsets = [0, 0], sizes = [8, 8], strides = [1, 1]} : vector<8x16xf32> to vector<8x8xf32>
    %116 = vector.extract_strided_slice %114 {offsets = [0, 8], sizes = [8, 8], strides = [1, 1]} : vector<8x16xf32> to vector<8x8xf32>
    %117 = arith.mulf %115, %116 : vector<8x8xf32>
    %cst_45 = arith.constant 1.000000e+00 : f32
    %118 = vector.broadcast %cst_45 : f32 to vector<1x8xf32>
    %cst_46 = arith.constant dense<0.000000e+00> : vector<1x8xf32>
    %119 = tpu.matmul %118, %117, %cst_46 {dimension_numbers = #tpu.dot_dimension_numbers<[1], [1], [0], [0], [0, 0, 1, 0], [], []>} : vector<1x8xf32>, vector<8x8xf32>, vector<1x8xf32> -> vector<1x8xf32>
    %c0_47 = arith.constant 0 : index
    %c0_48 = arith.constant 0 : index
    %120 = vector.load %arg6[%c0_47, %c0_48] : memref<1x8xf32, #tpu.memory_space<vmem>>, vector<1x8xf32>
    tpu.vector_store %arg6[%c0_47, %c0_48], %119 {strides = array<i32>} : memref<1x8xf32, #tpu.memory_space<vmem>>, vector<1x8xf32>,
    return
  }
}

</mosaic_0001>

<bundles_post_ra>
// kernel: tpu_custom_call.1
= control target key start
LH: loop header
LB: loop body
LE: loop exit
PB: predicated region body
PF: predicated region fallthrough
CT: control target
= control target key end

     0   :  { %11 = vsyncpa [#allocation3], 0  ;;  %s1769_s0 = inlined_call_operand.vmem [shape: f32[8,18], index: 0, kind: input, shape index: {}]   ;;  %s1770_s1 = inlined_call_operand.vmem [shape: f32[18,64], index: 1, kind: input, shape index: {}]   ;;  %s1771_s2 = inlined_call_operand.hbm [shape: f32[3,64,64], index: 2, kind: input, shape index: {}]   ;;  %s1772_s3 = inlined_call_operand.vmem [shape: f32[64,16], index: 3, kind: input, shape index: {}]   ;;  %s1773_s4 = inlined_call_operand.vmem [shape: f32[1,16], index: 4, kind: input, shape index: {}]   ;;  %s1774_s5 = inlined_call_operand.vmem [shape: f32[8,64], index: 5, kind: input, shape index: {}]   ;;  %s1775_s6 = inlined_call_operand.hbm [shape: f32[1,8], index: 6, kind: output, shape index: {}]  }
   0x1   :  { %12 = vsyncpa [#allocation4], 0  ;;  %s1561_s21 = smov [#allocation2]   ;;  %s1513_s25 = scalar_lea.hbm %s1771_s2, 3072 }
   0x2   :  { %s22_s22 = sshll.u32 %s1561_s21, 4  ;;  %p1514_p0 = scmp.ne.s32.totalorder %s1771_s2, %s1513_s25  ;;  %s23_s22 = int_to_ptr.vmem [resolvable:$true] %s22_s22 }
   0x3   :  { %p1517_p1 = scmp.lt.u32.totalorder %s1513_s25, %s1771_s2 }
   0x5   :  { %p1519_p2 = pnand %p1517_p1, %p1514_p0 }
   0x7   :  { %1522 = shalt.err (!%p1519_p2)
}
   0x8   :  { %s1523_s30 = scalar_lea.vmem %s23_s22, 3072  ;;  %p1528_p4 = scmp.lt.s32.totalorder %s23_s22, %s23_s22 }
   0x9   :  { %p1524_p3 = scmp.ne.s32.totalorder %s23_s22, %s1523_s30  ;;  %p1529_p5 = scmp.lt.s32.totalorder %s1523_s30, %s1523_s30 }
   0xb   :  { %p1530_p6 = por %p1529_p5, %p1528_p4 }
   0xd   :  { %p1531_p7 = pnand %p1530_p6, %p1524_p3 }
   0xf   :  { %1534 = shalt.err (!%p1531_p7)
}
  0x10   :  { %s1562_s7 = smov 128   ;;  %s1563_s8 = smov 8  }
  0x11   :  { %28 = dma.hbm_to_vmem [thread:$0]  %s1771_s2, 3072, %s23_s22, [#allocation3], %s1562_s7, %s1562_s7, %s1563_s8  }
  0x12   :  { %1557 = dma.done.wait [#allocation3], 3072  }
  0x13   :  { %1558 = vsyncadd [#allocation3], 4294964224  ;;  %v1564_v0 = vmov 0.0|0.0   ;;  %vm1565_vm0 = vmmov 0   ;;  %v1566_v1 = vmov 0.0   ;;  %v40_v2 = vld [vmem:[%s1770_s1] sm:$0xff]  ;;  %v279_v33 = vlaneseq }
  0x14   :  { %1437 = vmatprep.subr.bf16.mxu0 %v1564_v0  ;;  %1313 = vmatprep.mubr.msk.f32.mxu0 %vm1565_vm0, %v1566_v1  ;;  %v41_v3 = vld [vmem:[%s1770_s1 + $0x8] sm:$0xff]  ;;  %v42_v5 = vld [vmem:[%s1770_s1 + $0x10] sm:$0x3]  ;;  %vm47_vm1 = vcmask 1041408   ;;  %v38_v6 = vld [vmem:[%s1769_s0] sm:$0xff]  ;;  %vm43_vm2 = vcmask 146432  }
  0x15   :  { %1316 = vmatprep.subr.mxu1 %v1566_v1  ;;  %1318 = vmatprep.mubr.msk.f32.mxu1 %vm1565_vm0, %v1566_v1  ;;  %v1438_v4 = vpack.c.bf16 %v41_v3, %v40_v2  ;;  %vm121_vm3 = vcmask 64512   ;;  %v1567_v10 = vmov 1.0   ;;  %v290_v11 = vld [vmem:[#allocation2] sm:$0xff]  ;;  %v291_v12 = vld [vmem:[#allocation2 + $0x8] sm:$0xff]  ;;  %v292_v14 = vld [vmem:[#allocation2 + $0x10] sm:$0xff]  ;;  %v1653_v34 = vshrl.u32 %v279_v33, 7 }
  0x16   :  { %v1441_v13 = vpack.c.bf16 %v291_v12, %v290_v11  ;;  %v293_v15 = vld [vmem:[#allocation2 + $0x18] sm:$0xff]  ;;  %v294_v17 = vld [vmem:[#allocation2 + $0x20] sm:$0xff]  ;;  %v295_v18 = vld [vmem:[#allocation2 + $0x28] sm:$0xff]  ;;  %vm298_vm4 = vcmask 523264   ;;  %s1568_s10 = smov 120   ;;  %s1569_s11 = smov [#allocation5]  }
  0x17   :  { %1439 = vmatpush3.bf16.msra.mxu0 %v1438_v4  ;;  %v1444_v16 = vpack.c.bf16 %v293_v15, %v292_v14  ;;  %v1447_v19 = vpack.c.bf16 %v295_v18, %v294_v17  ;;  %v296_v20 = vld [vmem:[#allocation2 + $0x30] sm:$0xff]  ;;  %v297_v21 = vld [vmem:[#allocation2 + $0x38] sm:$0xff]  ;;  %v1658_v35 = vld [vmem:[%s1774_s5] sm:$0xff]  ;;  %v281_v36 = vsub.s32 0, %v1653_v34  ;;  %v286_v43 = vsub.s32 4, %v1653_v34  ;;  %s1223_s12 = sshll.u32 %s1569_s11, 4  ;;  %s1224_s12 = int_to_ptr.vmem [resolvable:$true] %s1223_s12 }
  0x18   :  { %1311 = vmatprep.subr.mxu0 %v1566_v1  ;;  %v1450_v22 = vpack.c.bf16 %v297_v21, %v296_v20  ;;  %v544_v51 = vld [vmem:[#allocation2 + $0x40] sm:$0xff]  ;;  %v545_v52 = vld [vmem:[#allocation2 + $0x48] sm:$0xff]  ;;  %v546_v54 = vld [vmem:[#allocation2 + $0x50] sm:$0xff]  ;;  %v534_v14 = vsub.s32 1, %v1653_v34  ;;  %v539_v21 = vsub.s32 5, %v1653_v34  ;;  %vm1215_vm5 = vcmask 57344   ;;  %p1540_p9 = scmp.lt.s32.totalorder %s1224_s12, %s1224_s12 }
  0x19   :  { %v1453_v53 = vpack.c.bf16 %v545_v52, %v544_v51  ;;  %v547_v55 = vld [vmem:[#allocation2 + $0x58] sm:$0xff]  ;;  %v548_v57 = vld [vmem:[#allocation2 + $0x60] sm:$0xff]  ;;  %v549_v58 = vld [vmem:[#allocation2 + $0x68] sm:$0xff]  ;;  %s1539_s2 = scalar_lea.vmem %s1224_s12, 32 }
  0x1a   :  { %v1456_v56 = vpack.c.bf16 %v547_v55, %v546_v54  ;;  %v1459_v59 = vpack.c.bf16 %v549_v58, %v548_v57  ;;  %v550_v60 = vld [vmem:[#allocation2 + $0x70] sm:$0xff]  ;;  %v551_v61 = vld [vmem:[#allocation2 + $0x78] sm:$0xff]  ;;  %v787_v55 = vsub.s32 2, %v1653_v34 }
  0x1b   :  { %1312 = vmatpush3.msk.msra.mxu0 %vm47_vm1, %v42_v5  ;;  %v1462_v62 = vpack.c.bf16 %v551_v61, %v550_v60  ;;  %v800_v33 = vld [vmem:[#allocation2 + $0x98] sm:$0xff] }
  0x1c   :  { %1314 = vmatmul.mubr.msk.f32.vlgmr.msra.gmra.mrb[0].mxu0 %vm43_vm2, %v38_v6  ;;  %1440 = vmatprep.subr.bf16.mxu0 %v1564_v0 }
  0x1d   :  { %1342 = vmatprep.mubr.msk.f32.mxu0 %vm1565_vm0, %v1566_v1  ;;  %1442 = vmatpush3.bf16.msra.mxu0 %v1441_v13 }
  0x1e   :  { %1443 = vmatprep.subr.bf16.mxu0 %v1564_v0 }
  0x21   :  { %1445 = vmatpush3.bf16.msra.mxu0 %v1444_v16 }
  0x22   :  { %1446 = vmatprep.subr.bf16.mxu0 %v1564_v0 }
  0x25   :  { %1448 = vmatpush3.bf16.msra.mxu0 %v1447_v19 }
  0x26   :  { %1449 = vmatprep.subr.bf16.mxu0 %v1564_v0 }
  0x29   :  { %1451 = vmatpush3.bf16.msra.mxu0 %v1450_v22 }
  0x2a   :  { %1374 = vmatprep.subr.mxu0 %v1566_v1 }
  0xef   :  { %v117_v7 = vpop.f32.mrb[0].mxu0 }
  0xf0   :  { %v195_v8 = vmul.f32 %v117_v7, %v117_v7  ;;  %v1315_v9 = vpop.f32.mrb[1].mxu0  ;;  %1317 = vmatpush3.msra.mxu1 %v117_v7 }
  0xf1   :  { %1319 = vmatmul.mubr.msk.f32.vlgmr.msra.gmra.mrb[0].mxu1 %vm121_vm3, %v1567_v10  ;;  %1321 = vmatprep.subr.mxu1 %v1566_v1 }
  0xf2   :  { %1322 = vmatpush3.msra.mxu1 %v195_v8  ;;  %1323 = vmatprep.mubr.msk.f32.mxu1 %vm1565_vm0, %v1566_v1 }
  0xf3   :  { %1345 = vmatprep.subr.mxu1 %v1566_v1 }
  0xf5   :  { %1324 = vmatmul.mubr.msk.f32.vlgmr.msra.gmra.mrb[2].mxu1 %vm121_vm3, %v1567_v10 }
  0xf6   :  { %1347 = vmatprep.mubr.msk.f32.mxu1 %vm1565_vm0, %v1566_v1 }
 0x1c4   :  { %v191_v23 = vpop.f32.mrb[0].mxu1 }
 0x1c5   :  { %v266_v24 = vmul.f32 0.125, %v191_v23  ;;  %v1320_v25 = vpop.f32.mrb[1].mxu1 }
 0x1c7   :  { %v268_v27 = vmul.f32 %v266_v24, %v266_v24 }
 0x1c8   :  { %v262_v26 = vpop.f32.mrb[2].mxu1 }
 0x1c9   :  { %v267_v28 = vmul.f32 0.125, %v262_v26  ;;  %v1325_v29 = vpop.f32.mrb[3].mxu1 }
 0x1ca   :  { %v797_v29 = vld [vmem:[#allocation2 + $0x80] sm:$0xff] }
 0x1cb   :  { %v269_v30 = vsub.f32 %v267_v28, %v268_v27 }
 0x1cd   :  { %v270_v31 = vmax.f32 %v269_v30, 0.0  ;;  %v798_v30 = vld [vmem:[#allocation2 + $0x88] sm:$0xff] }
 0x1cf   :  { %v271_v32 = vadd.f32 1e-05, %v270_v31  ;;  %v1465_v31 = vpack.c.bf16 %v798_v30, %v797_v29 }
 0x1d1   :  { %1497 = vrsqrt.f32 %v271_v32  ;;  %v799_v32 = vld [vmem:[#allocation2 + $0x90] sm:$0xff] }
 0x1db   :  { %v1498_v37 = vpop.eup %1497 }
 0x1dc   :  { %v273_v38 = vmul.f32 %v1498_v37, %v1658_v35  ;;  %v801_v37 = vld [vmem:[#allocation2 + $0xa0] sm:$0xff] }
 0x1de   :  { %v274_v39 = vmul.f32 %v273_v38, %v266_v24  ;;  %v282_v40 = vrot.slane %v273_v38, %v281_v36  ;;  %v1468_v36 = vpack.c.bf16 %v800_v33, %v799_v32  ;;  %v802_v38 = vld [vmem:[#allocation2 + $0xa8] sm:$0xff]  ;;  %v1040_v32 = vsub.s32 3, %v1653_v34 }
 0x1e0   :  { %v276_v41 = vrot.slane %v274_v39, 4  ;;  %v283_v42 = vmul.f32 %v282_v40, %v117_v7  ;;  %v1471_v39 = vpack.c.bf16 %v802_v38, %v801_v37  ;;  %v803_v40 = vld [vmem:[#allocation2 + $0xb0] sm:$0xff] }
 0x1e2   :  { %v278_v44 = vsub.f32 %v1658_v35, %v276_v41  ;;  %v804_v41 = vld [vmem:[#allocation2 + $0xb8] sm:$0xff] }
 0x1e4   :  { %v287_v45 = vrot.slane %v278_v44, %v286_v43 }
 0x1e6   :  { %v288_v46 = vadd.f32 %v287_v45, %v283_v42  ;;  %v1474_v42 = vpack.c.bf16 %v804_v41, %v803_v40  ;;  %v1045_v40 = vsub.s32 7, %v1653_v34 }
 0x1e8   :  { %1499 = vtanh.f32 %v288_v46 }
 0x1f2   :  { %v1500_v47 = vpop.eup %1499 }
 0x1f3   :  { %1343 = vmatmul.mubr.msk.f32.vlgmr.msra.gmra.mrb[2].mxu0 %vm298_vm4, %v1500_v47 }
 0x1f4   :  { %1376 = vmatprep.mubr.msk.f32.mxu0 %vm1565_vm0, %v1566_v1 }
 0x2c6   :  { %v368_v48 = vpop.f32.mrb[2].mxu0 }
 0x2c7   :  { %v442_v49 = vmul.f32 %v368_v48, %v368_v48  ;;  %v1344_v50 = vpop.f32.mrb[3].mxu0  ;;  %1346 = vmatpush3.msra.mxu1 %v368_v48 }
 0x2c8   :  { %1348 = vmatmul.mubr.msk.f32.vlgmr.msra.gmra.mrb[4].mxu1 %vm121_vm3, %v1567_v10  ;;  %1350 = vmatprep.subr.mxu1 %v1566_v1 }
 0x2c9   :  { %1351 = vmatpush3.msra.mxu1 %v442_v49  ;;  %1352 = vmatprep.mubr.msk.f32.mxu1 %vm1565_vm0, %v1566_v1 }
 0x2ca   :  { %1452 = vmatprep.subr.bf16.mxu1 %v1564_v0 }
 0x2cc   :  { %1353 = vmatmul.mubr.msk.f32.vlgmr.msra.gmra.mrb[6].mxu1 %vm121_vm3, %v1567_v10 }
 0x2cd   :  { %1371 = vmatprep.mubr.msk.f32.mxu1 %vm1565_vm0, %v1566_v1  ;;  %1454 = vmatpush3.bf16.msra.mxu1 %v1453_v53 }
 0x2ce   :  { %1455 = vmatprep.subr.bf16.mxu1 %v1564_v0 }
 0x2d1   :  { %1457 = vmatpush3.bf16.msra.mxu1 %v1456_v56 }
 0x2d2   :  { %1458 = vmatprep.subr.bf16.mxu1 %v1564_v0 }
 0x2d5   :  { %1460 = vmatpush3.bf16.msra.mxu1 %v1459_v59 }
 0x2d6   :  { %1461 = vmatprep.subr.bf16.mxu1 %v1564_v0 }
 0x2d9   :  { %1463 = vmatpush3.bf16.msra.mxu1 %v1462_v62  ;;  %v792_v62 = vsub.s32 6, %v1653_v34 }
 0x2da   :  { %1403 = vmatprep.subr.mxu1 %v1566_v1 }
 0x39b   :  { %v438_v63 = vpop.f32.mrb[4].mxu1 }
 0x39c   :  { %v513_v2 = vmul.f32 0.125, %v438_v63  ;;  %v1349_v3 = vpop.f32.mrb[5].mxu1 }
 0x39e   :  { %v515_v5 = vmul.f32 %v513_v2, %v513_v2 }
 0x39f   :  { %v509_v4 = vpop.f32.mrb[6].mxu1 }
 0x3a0   :  { %v514_v6 = vmul.f32 0.125, %v509_v4  ;;  %v1354_v7 = vpop.f32.mrb[7].mxu1 }
 0x3a2   :  { %v516_v8 = vsub.f32 %v514_v6, %v515_v5 }
 0x3a4   :  { %v517_v9 = vmax.f32 %v516_v8, 0.0  ;;  %v1049_v8 = vld [vmem:[%s1772_s3] sm:$0xff] }
 0x3a6   :  { %v518_v11 = vadd.f32 1e-05, %v517_v9  ;;  %v1050_v9 = vld [vmem:[%s1772_s3 + $0x8] sm:$0xff] }
 0x3a8   :  { %1501 = vrsqrt.f32 %v518_v11  ;;  %v1477_v11 = vpack.c.bf16 %v1050_v9, %v1049_v8 }
 0x3b2   :  { %v1502_v12 = vpop.eup %1501 }
 0x3b3   :  { %v521_v13 = vrot.slane %v1502_v12, 7  ;;  %v1051_v12 = vld [vmem:[%s1772_s3 + $0x10] sm:$0xff] }
 0x3b5   :  { %v523_v15 = vmul.f32 %v521_v13, %v1658_v35 }
 0x3b7   :  { %v525_v16 = vrot.slane %v523_v15, 1  ;;  %v535_v17 = vrot.slane %v523_v15, %v534_v14  ;;  %v1053_v14 = vld [vmem:[%s1772_s3 + $0x20] sm:$0xff]  ;;  %v1054_v15 = vld [vmem:[%s1772_s3 + $0x28] sm:$0xff] }
 0x3b9   :  { %v527_v18 = vmul.f32 %v525_v16, %v513_v2  ;;  %v536_v19 = vmul.f32 %v535_v17, %v368_v48  ;;  %v1483_v16 = vpack.c.bf16 %v1054_v15, %v1053_v14  ;;  %v1055_v17 = vld [vmem:[%s1772_s3 + $0x30] sm:$0xff] }
 0x3bb   :  { %v529_v20 = vrot.slane %v527_v18, 3  ;;  %v1056_v18 = vld [vmem:[%s1772_s3 + $0x38] sm:$0xff] }
 0x3bd   :  { %v531_v22 = vsub.f32 %v1658_v35, %v529_v20 }
 0x3bf   :  { %v540_v23 = vrot.slane %v531_v22, %v539_v21 }
 0x3c1   :  { %v541_v24 = vadd.f32 %v540_v23, %v536_v19  ;;  %v1486_v19 = vpack.c.bf16 %v1056_v18, %v1055_v17 }
 0x3c3   :  { %1503 = vtanh.f32 %v541_v24 }
 0x3cd   :  { %v1504_v25 = vpop.eup %1503 }
 0x3ce   :  { %1372 = vmatmul.mubr.msk.f32.vlgmr.msra.gmra.mrb[8].mxu1 %vm298_vm4, %v1504_v25 }
 0x3cf   :  { %1405 = vmatprep.mubr.msk.f32.mxu1 %vm1565_vm0, %v1566_v1 }
 0x4a1   :  { %v621_v26 = vpop.f32.mrb[8].mxu1 }
 0x4a2   :  { %v695_v27 = vmul.f32 %v621_v26, %v621_v26  ;;  %v1373_v28 = vpop.f32.mrb[9].mxu1  ;;  %1375 = vmatpush3.msra.mxu0 %v621_v26 }
 0x4a3   :  { %1377 = vmatmul.mubr.msk.f32.vlgmr.msra.gmra.mrb[4].mxu0 %vm121_vm3, %v1567_v10  ;;  %1379 = vmatprep.subr.mxu0 %v1566_v1 }
 0x4a4   :  { %1380 = vmatpush3.msra.mxu0 %v695_v27  ;;  %1381 = vmatprep.mubr.msk.f32.mxu0 %vm1565_vm0, %v1566_v1 }
 0x4a5   :  { %1464 = vmatprep.subr.bf16.mxu0 %v1564_v0 }
 0x4a7   :  { %1382 = vmatmul.mubr.msk.f32.vlgmr.msra.gmra.mrb[6].mxu0 %vm121_vm3, %v1567_v10 }
 0x4a8   :  { %1400 = vmatprep.mubr.msk.f32.mxu0 %vm1565_vm0, %v1566_v1  ;;  %1466 = vmatpush3.bf16.msra.mxu0 %v1465_v31 }
 0x4a9   :  { %1467 = vmatprep.subr.bf16.mxu0 %v1564_v0 }
 0x4ac   :  { %1469 = vmatpush3.bf16.msra.mxu0 %v1468_v36 }
 0x4ad   :  { %1470 = vmatprep.subr.bf16.mxu0 %v1564_v0 }
 0x4b0   :  { %1472 = vmatpush3.bf16.msra.mxu0 %v1471_v39 }
 0x4b1   :  { %1473 = vmatprep.subr.bf16.mxu0 %v1564_v0 }
 0x4b4   :  { %1475 = vmatpush3.bf16.msra.mxu0 %v1474_v42 }
 0x4b5   :  { %1432 = vmatprep.subr.mxu0 %v1566_v1 }
 0x576   :  { %v691_v43 = vpop.f32.mrb[4].mxu0 }
 0x577   :  { %v766_v44 = vmul.f32 0.125, %v691_v43  ;;  %v1378_v45 = vpop.f32.mrb[5].mxu0 }
 0x578   :  { %v1245_v45 = vld [vmem:[%s1773_s4] ss:$0 sm:$0xff]  ;;  %s1535_s4 = scalar_lea.vmem %s1224_s12, 16 }
 0x579   :  { %v768_v47 = vmul.f32 %v766_v44, %v766_v44  ;;  %p1536_p8 = scmp.ne.s32.totalorder %s1224_s12, %s1535_s4  ;;  %p1541_p10 = scmp.lt.s32.totalorder %s1539_s2, %s1535_s4 }
 0x57a   :  { %v762_v46 = vpop.f32.mrb[6].mxu0 }
 0x57b   :  { %v767_v48 = vmul.f32 0.125, %v762_v46  ;;  %v1383_v49 = vpop.f32.mrb[7].mxu0  ;;  %p1542_p11 = por %p1541_p10, %p1540_p9 }
 0x57d   :  { %v769_v50 = vsub.f32 %v767_v48, %v768_v47  ;;  %p1543_p12 = pnand %p1542_p11, %p1536_p8 }
 0x57f   :  { %v770_v51 = vmax.f32 %v769_v50, 0.0 }
 0x581   :  { %v771_v52 = vadd.f32 1e-05, %v770_v51 }
 0x583   :  { %1505 = vrsqrt.f32 %v771_v52 }
 0x58d   :  { %v1506_v53 = vpop.eup %1505 }
 0x58e   :  { %v774_v54 = vrot.slane %v1506_v53, 6 }
 0x590   :  { %v776_v56 = vmul.f32 %v774_v54, %v1658_v35 }
 0x592   :  { %v778_v57 = vrot.slane %v776_v56, 2  ;;  %v788_v58 = vrot.slane %v776_v56, %v787_v55 }
 0x594   :  { %v780_v59 = vmul.f32 %v778_v57, %v766_v44  ;;  %v789_v60 = vmul.f32 %v788_v58, %v621_v26 }
 0x596   :  { %v782_v61 = vrot.slane %v780_v59, 2 }
 0x598   :  { %v784_v63 = vsub.f32 %v1658_v35, %v782_v61 }
 0x59a   :  { %v793_v2 = vrot.slane %v784_v63, %v792_v62 }
 0x59c   :  { %v794_v3 = vadd.f32 %v793_v2, %v789_v60 }
 0x59e   :  { %1507 = vtanh.f32 %v794_v3 }
 0x5a8   :  { %v1508_v4 = vpop.eup %1507 }
 0x5a9   :  { %1401 = vmatmul.mubr.msk.f32.vlgmr.msra.gmra.mrb[8].mxu0 %vm298_vm4, %v1508_v4 }
 0x5aa   :  { %1434 = vmatprep.mubr.msk.f32.mxu0 %vm1565_vm0, %v1566_v1 }
 0x67c   :  { %v874_v5 = vpop.f32.mrb[8].mxu0 }
 0x67d   :  { %v948_v6 = vmul.f32 %v874_v5, %v874_v5  ;;  %v1402_v7 = vpop.f32.mrb[9].mxu0  ;;  %1404 = vmatpush3.msra.mxu1 %v874_v5 }
 0x67e   :  { %1406 = vmatmul.mubr.msk.f32.vlgmr.msra.gmra.mrb[10].mxu1 %vm121_vm3, %v1567_v10  ;;  %1408 = vmatprep.subr.mxu1 %v1566_v1 }
 0x67f   :  { %1409 = vmatpush3.msra.mxu1 %v948_v6  ;;  %1410 = vmatprep.mubr.msk.f32.mxu1 %vm1565_vm0, %v1566_v1 }
 0x680   :  { %1476 = vmatprep.subr.bf16.mxu1 %v1564_v0 }
 0x682   :  { %1411 = vmatmul.mubr.msk.f32.vlgmr.msra.gmra.mrb[12].mxu1 %vm121_vm3, %v1567_v10 }
 0x683   :  { %1429 = vmatprep.mubr.msk.f32.mxu1 %vm1565_vm0, %v1566_v1  ;;  %1478 = vmatpush3.bf16.msra.mxu1 %v1477_v11  ;;  %v1052_v1 = vld [vmem:[%s1772_s3 + $0x18] sm:$0xff] }
 0x684   :  { %1479 = vmatprep.subr.bf16.mxu1 %v1564_v0  ;;  %v1480_v13 = vpack.c.bf16 %v1052_v1, %v1051_v12 }
 0x687   :  { %1481 = vmatpush3.bf16.msra.mxu1 %v1480_v13 }
 0x688   :  { %1482 = vmatprep.subr.bf16.mxu1 %v1564_v0 }
 0x68b   :  { %1484 = vmatpush3.bf16.msra.mxu1 %v1483_v16 }
 0x68c   :  { %1485 = vmatprep.subr.bf16.mxu1 %v1564_v0 }
 0x68f   :  { %1487 = vmatpush3.bf16.msra.mxu1 %v1486_v19 }
 0x751   :  { %v944_v20 = vpop.f32.mrb[10].mxu1 }
 0x752   :  { %v1019_v21 = vmul.f32 0.125, %v944_v20  ;;  %v1407_v22 = vpop.f32.mrb[11].mxu1 }
 0x754   :  { %v1021_v24 = vmul.f32 %v1019_v21, %v1019_v21 }
 0x755   :  { %v1015_v23 = vpop.f32.mrb[12].mxu1 }
 0x756   :  { %v1020_v25 = vmul.f32 0.125, %v1015_v23  ;;  %v1412_v26 = vpop.f32.mrb[13].mxu1 }
 0x758   :  { %v1022_v27 = vsub.f32 %v1020_v25, %v1021_v24 }
 0x75a   :  { %v1023_v28 = vmax.f32 %v1022_v27, 0.0 }
 0x75c   :  { %v1024_v29 = vadd.f32 1e-05, %v1023_v28 }
 0x75e   :  { %1509 = vrsqrt.f32 %v1024_v29 }
 0x768   :  { %v1510_v30 = vpop.eup %1509 }
 0x769   :  { %v1027_v31 = vrot.slane %v1510_v30, 5 }
 0x76b   :  { %v1029_v33 = vmul.f32 %v1027_v31, %v1658_v35 }
 0x76d   :  { %v1031_v36 = vrot.slane %v1029_v33, 3  ;;  %v1041_v0 = vrot.slane %v1029_v33, %v1040_v32 }
 0x76f   :  { %v1033_v37 = vmul.f32 %v1031_v36, %v1019_v21  ;;  %v1042_v38 = vmul.f32 %v1041_v0, %v874_v5 }
 0x771   :  { %v1035_v39 = vrot.slane %v1033_v37, 1 }
 0x773   :  { %v1037_v41 = vsub.f32 %v1658_v35, %v1035_v39 }
 0x775   :  { %v1046_v42 = vrot.slane %v1037_v41, %v1045_v40 }
 0x777   :  { %v1047_v43 = vadd.f32 %v1046_v42, %v1042_v38 }
 0x779   :  { %1511 = vtanh.f32 %v1047_v43 }
 0x783   :  { %v1512_v44 = vpop.eup %1511 }
 0x784   :  { %1430 = vmatmul.mubr.msk.f32.vlgmr.msra.gmra.mrb[14].mxu1 %vm298_vm4, %v1512_v44 }
 0x857   :  { %v1133_v46 = vpop.f32.mrb[14].mxu1 }
 0x858   :  { %v1134_v47 = vadd.f32 %v1245_v45, %v1133_v46  ;;  %v1431_v48 = vpop.f32.mrb[15].mxu1 }
 0x85a   :  { %1138 = vrot.lane.b32.xlu0 %v1134_v47, %s1568_s10 }
 0x8cc   :  { %v1139_v49 = vpop.permute.xlu0 %1138 }
 0x8cd   :  { %v1141_v50 = vmul.f32 %v1139_v49, %v1134_v47 }
 0x8cf   :  { %1433 = vmatpush3.xpose.msk.msra.mxu0 %vm121_vm3, %v1141_v50 }
 0x8d2   :  { %1435 = vmatmul.mubr.msk.f32.vlgmr.msra.gmra.mrb[10].mxu0 %vm121_vm3, %v1567_v10 }
 0x9a5   :  { %v1211_v34 = vpop.f32.mrb[10].mxu0 }
 0x9a6   :  { %v1436_v35 = vpop.f32.mrb[11].mxu0  ;;  %1216 = vst.msk [vmem:[#allocation5] sm:$0x1] %vm1215_vm5, %v1211_v34 }
 0x9a7   :  { %1546 = shalt.err (!%p1543_p12)
}
 0x9a8   :  { %s1547_s15 = scalar_lea.hbm %s1775_s6, 16 }
 0x9a9   :  { %p1548_p13 = scmp.ne.s32.totalorder %s1775_s6, %s1547_s15  ;;  %p1551_p0 = scmp.lt.u32.totalorder %s1547_s15, %s1775_s6 }
 0x9ab   :  { %p1553_p1 = pnand %p1551_p0, %p1548_p13 }
 0x9ad   :  { %1556 = shalt.err (!%p1553_p1)
}
 0x9ae   :  { %1226 = dma.vmem_to_hbm [thread:$0]  %s1224_s12, 16, %s1775_s6, [#allocation4]  }
 0x9af   :  { %1559 = dma.done.wait [#allocation4], 16  }
 0x9b0   :  { %1560 = vsyncadd [#allocation4], 4294967280 }
 0x9b1   :  { %1230 = vsyncpa [#allocation3], 1 }
 0x9b2   :  { %1231 = vsyncpa [#allocation4], 1 }

</bundles_post_ra>
